<compile_context>
chip_gen: v6e
topology: v6e:2x2x1
jax: 0.10.0
libtpu: 0.0.40
codegen_flags: <defaults>
</compile_context>

<pallas_src>
import functools
import math

import jax
import jax.numpy as jnp
from jax.experimental import pallas as pl
from jax.experimental.pallas import tpu as pltpu


def _round_up(n: int, m: int) -> int:
    return (n + m - 1) // m * m


def _mlp_kernel(x_ref, b_ref, *w_and_out_refs, pad_outs):
    """Fused MLP forward on one batch tile; all weights/biases are VMEM-resident."""
    o_ref = w_and_out_refs[-1]
    w_refs = w_and_out_refs[:-1]
    last = len(w_refs) - 1
    inv_sqrt2 = 1.0 / math.sqrt(2.0)

    b_all = b_ref[...]                 # (num_linear, max_pad_out), f32 — loaded once
    h = x_ref[...]                     # (tB, pad_in0), native dtype (no upcast)
    for i, w_ref in enumerate(w_refs):
        b = b_all[i:i + 1, :pad_outs[i]]                       # (1, pad_out_i)
        # MXU matmul with f32 accumulation regardless of operand dtype.
        h = jnp.dot(h, w_ref[...], preferred_element_type=jnp.float32) + b
        if i < last:
            # Exact (erf-based) GELU in f32, matching torch.nn.GELU(approximate='none').
            h = 0.5 * h * (1.0 + jax.lax.erf(h * inv_sqrt2))
        # (Dropout = identity in eval mode.)
    o_ref[...] = h.astype(o_ref.dtype)


def mlp_forward(params, x, *, block_batch: int = 512):
    """Equivalent of MLP.forward for params = [(w0, b0), ..., (wL, bL)], w_i: [n_in, n_out]."""
    B, n_in0 = x.shape
    n_out_last = params[-1][0].shape[1]
    num_linear = len(params)

    pad_ins = [_round_up(w.shape[0], 128) for w, _ in params]
    pad_outs = [_round_up(w.shape[1], 128) for w, _ in params]
    max_pad_out = max(pad_outs)

    # Batch tiling: sublane-aligned blocks of up to `block_batch` rows.
    tB = _round_up(min(block_batch, _round_up(B, 8)), 8)
    B_pad = _round_up(B, tB)

    # Zero-pad everything to lane-dense shapes.
    x_p = jnp.pad(x, ((0, B_pad - B), (0, pad_ins[0] - n_in0)))
    w_pads = [
        jnp.pad(w, ((0, pi - w.shape[0]), (0, po - w.shape[1])))
        for (w, _), pi, po in zip(params, pad_ins, pad_outs)
    ]
    b_stack = jnp.zeros((num_linear, max_pad_out), jnp.float32)
    for i, (_, b) in enumerate(params):
        b_stack = b_stack.at[i, : b.shape[0]].set(b.astype(jnp.float32))

    grid = (B_pad // tB,)
    in_specs = [
        pl.BlockSpec((tB, pad_ins[0]), lambda i: (i, 0)),            # batch-tiled input
        pl.BlockSpec((num_linear, max_pad_out), lambda i: (0, 0)),   # stacked biases, resident
    ] + [
        pl.BlockSpec((pi, po), lambda i: (0, 0))                     # weights, resident
        for pi, po in zip(pad_ins, pad_outs)
    ]
    out_specs = pl.BlockSpec((tB, pad_outs[-1]), lambda i: (i, 0))

    kernel = functools.partial(_mlp_kernel, pad_outs=tuple(pad_outs))
    out_p = pl.pallas_call(
        kernel,
        out_shape=jax.ShapeDtypeStruct((B_pad, pad_outs[-1]), x.dtype),
        grid=grid,
        in_specs=in_specs,
        out_specs=out_specs,
        compiler_params=pltpu.CompilerParams(
            dimension_semantics=("parallel",),   # shard batch tiles across TCs on v7x
        ),
    )(x_p, b_stack, *w_pads)
    return out_p[:B, :n_out_last]


def init_mlp_params(key, input_size, hidden_size, output_size, num_layers):
    """Deterministic init mimicking nn.Linear's default U(-1/sqrt(n_in), 1/sqrt(n_in))."""
    params = []
    for i in range(num_layers + 1):
        n_in = input_size if i == 0 else hidden_size
        n_out = hidden_size if i < num_layers else output_size
        key, kw, kb = jax.random.split(key, 3)
        bound = 1.0 / math.sqrt(n_in)
        w = jax.random.uniform(kw, (n_in, n_out), jnp.float32, -bound, bound)
        b = jax.random.uniform(kb, (n_out,), jnp.float32, -bound, bound)
        params.append((w, b))
    return params


def mlp_reference(params, x):
    """Pure-JAX reference for correctness checking."""
    num_layers = len(params) - 1
    h = x
    for i, (w, b) in enumerate(params):
        h = h @ w + b
        if i < num_layers:
            h = 0.5 * h * (1.0 + jax.lax.erf(h * (1.0 / math.sqrt(2.0))))
    return h


if __name__ == "__main__":
    # Small shapes implied by the forward: input [batch, input_size].
    batch, input_size, hidden_size, output_size, num_layers = 8, 32, 64, 16, 2

    key = jax.random.PRNGKey(0)
    key, kx = jax.random.split(key)
    x = jax.random.normal(kx, (batch, input_size), dtype=jnp.float32)

    params = init_mlp_params(key, input_size, hidden_size, output_size, num_layers)

    out = mlp_forward(params, x)
    out = jax.block_until_ready(out)

    ref = mlp_reference(params, x)
    assert out.shape == (batch, output_size)
    assert jnp.allclose(out, ref, atol=1e-5, rtol=1e-5), "Pallas MLP mismatch vs reference"

    print("KERNEL_OK")
</pallas_src>

<mosaic_0001>
module attributes {stable_mosaic.version = 11 : i64} {
  func.func @_mlp_kernel(%arg0: i32, %arg1: memref<8x128xf32, #tpu.memory_space<vmem>>, %arg2: memref<3x128xf32, #tpu.memory_space<vmem>>, %arg3: memref<128x128xf32, #tpu.memory_space<vmem>>, %arg4: memref<128x128xf32, #tpu.memory_space<vmem>>, %arg5: memref<128x128xf32, #tpu.memory_space<vmem>>, %arg6: memref<8x128xf32, #tpu.memory_space<vmem>>) attributes {dimension_semantics = [#tpu.dimension_semantics<parallel>], iteration_bounds = array<i64: 1>, scalar_prefetch = 0 : i64, scratch_operands = 0 : i64, tpu.core_type = #tpu.core_type<tc>, window_params = [{transform_indices = @transform_0, window_bounds = array<i64: 8, 128>}, {pipeline_mode = #tpu.pipeline_mode<synchronous>, transform_indices = @transform_1, window_bounds = array<i64: 3, 128>}, {pipeline_mode = #tpu.pipeline_mode<synchronous>, transform_indices = @transform_2, window_bounds = array<i64: 128, 128>}, {pipeline_mode = #tpu.pipeline_mode<synchronous>, transform_indices = @transform_3, window_bounds = array<i64: 128, 128>}, {pipeline_mode = #tpu.pipeline_mode<synchronous>, transform_indices = @transform_4, window_bounds = array<i64: 128, 128>}, {transform_indices = @transform_5, window_bounds = array<i64: 8, 128>}]} {
    %c0 = arith.constant 0 : index
    %c0_0 = arith.constant 0 : index
    %0 = vector.load %arg2[%c0, %c0_0] : memref<3x128xf32, #tpu.memory_space<vmem>>, vector<3x128xf32>
    %c0_1 = arith.constant 0 : index
    %c0_2 = arith.constant 0 : index
    %1 = vector.load %arg1[%c0_1, %c0_2] : memref<8x128xf32, #tpu.memory_space<vmem>>, vector<8x128xf32>
    %2 = vector.extract_strided_slice %0 {offsets = [0, 0], sizes = [1, 128], strides = [1, 1]} : vector<3x128xf32> to vector<1x128xf32>
    %c0_3 = arith.constant 0 : index
    %c0_4 = arith.constant 0 : index
    %3 = vector.load %arg3[%c0_3, %c0_4] : memref<128x128xf32, #tpu.memory_space<vmem>>, vector<128x128xf32>
    %cst = arith.constant dense<0.000000e+00> : vector<8x128xf32>
    %4 = tpu.matmul %1, %3, %cst {dimension_numbers = #tpu.dot_dimension_numbers<[1], [0], [0], [1], [0, 0, 1, 1], [], []>} : vector<8x128xf32>, vector<128x128xf32>, vector<8x128xf32> -> vector<8x128xf32>
    %5 = vector.broadcast %2 : vector<1x128xf32> to vector<8x128xf32>
    %6 = arith.addf %4, %5 : vector<8x128xf32>
    %cst_5 = arith.constant 5.000000e-01 : f32
    %7 = vector.broadcast %cst_5 : f32 to vector<8x128xf32>
    %8 = arith.mulf %7, %6 : vector<8x128xf32>
    %cst_6 = arith.constant 0.707106769 : f32
    %9 = vector.broadcast %cst_6 : f32 to vector<8x128xf32>
    %10 = arith.mulf %6, %9 : vector<8x128xf32>
    %11 = math.erf %10 : vector<8x128xf32>
    %cst_7 = arith.constant 1.000000e+00 : f32
    %12 = vector.broadcast %cst_7 : f32 to vector<8x128xf32>
    %13 = arith.addf %12, %11 : vector<8x128xf32>
    %14 = arith.mulf %8, %13 : vector<8x128xf32>
    %15 = vector.extract_strided_slice %0 {offsets = [1, 0], sizes = [1, 128], strides = [1, 1]} : vector<3x128xf32> to vector<1x128xf32>
    %c0_8 = arith.constant 0 : index
    %c0_9 = arith.constant 0 : index
    %16 = vector.load %arg4[%c0_8, %c0_9] : memref<128x128xf32, #tpu.memory_space<vmem>>, vector<128x128xf32>
    %cst_10 = arith.constant dense<0.000000e+00> : vector<8x128xf32>
    %17 = tpu.matmul %14, %16, %cst_10 {dimension_numbers = #tpu.dot_dimension_numbers<[1], [0], [0], [1], [0, 0, 1, 1], [], []>} : vector<8x128xf32>, vector<128x128xf32>, vector<8x128xf32> -> vector<8x128xf32>
    %18 = vector.broadcast %15 : vector<1x128xf32> to vector<8x128xf32>
    %19 = arith.addf %17, %18 : vector<8x128xf32>
    %cst_11 = arith.constant 5.000000e-01 : f32
    %20 = vector.broadcast %cst_11 : f32 to vector<8x128xf32>
    %21 = arith.mulf %20, %19 : vector<8x128xf32>
    %cst_12 = arith.constant 0.707106769 : f32
    %22 = vector.broadcast %cst_12 : f32 to vector<8x128xf32>
    %23 = arith.mulf %19, %22 : vector<8x128xf32>
    %24 = math.erf %23 : vector<8x128xf32>
    %cst_13 = arith.constant 1.000000e+00 : f32
    %25 = vector.broadcast %cst_13 : f32 to vector<8x128xf32>
    %26 = arith.addf %25, %24 : vector<8x128xf32>
    %27 = arith.mulf %21, %26 : vector<8x128xf32>
    %28 = vector.extract_strided_slice %0 {offsets = [2, 0], sizes = [1, 128], strides = [1, 1]} : vector<3x128xf32> to vector<1x128xf32>
    %c0_14 = arith.constant 0 : index
    %c0_15 = arith.constant 0 : index
    %29 = vector.load %arg5[%c0_14, %c0_15] : memref<128x128xf32, #tpu.memory_space<vmem>>, vector<128x128xf32>
    %cst_16 = arith.constant dense<0.000000e+00> : vector<8x128xf32>
    %30 = tpu.matmul %27, %29, %cst_16 {dimension_numbers = #tpu.dot_dimension_numbers<[1], [0], [0], [1], [0, 0, 1, 1], [], []>} : vector<8x128xf32>, vector<128x128xf32>, vector<8x128xf32> -> vector<8x128xf32>
    %31 = vector.broadcast %28 : vector<1x128xf32> to vector<8x128xf32>
    %32 = arith.addf %30, %31 : vector<8x128xf32>
    %c0_17 = arith.constant 0 : index
    %c0_18 = arith.constant 0 : index
    %33 = vector.load %arg6[%c0_17, %c0_18] : memref<8x128xf32, #tpu.memory_space<vmem>>, vector<8x128xf32>
    tpu.vector_store %arg6[%c0_17, %c0_18], %32 {strides = array<i32>} : memref<8x128xf32, #tpu.memory_space<vmem>>, vector<8x128xf32>,
    return
  }
  func.func @transform_0(%arg0: i32) -> (i32, i32) {
    %c0_i32 = arith.constant 0 : i32
    %c0_i32_0 = arith.constant 0 : i32
    return %arg0, %c0_i32 : i32, i32
  }
  func.func @transform_1(%arg0: i32) -> (i32, i32) {
    %c0_i32 = arith.constant 0 : i32
    %c0_i32_0 = arith.constant 0 : i32
    %c0_i32_1 = arith.constant 0 : i32
    return %c0_i32, %c0_i32_0 : i32, i32
  }
  func.func @transform_2(%arg0: i32) -> (i32, i32) {
    %c0_i32 = arith.constant 0 : i32
    %c0_i32_0 = arith.constant 0 : i32
    %c0_i32_1 = arith.constant 0 : i32
    return %c0_i32, %c0_i32_0 : i32, i32
  }
  func.func @transform_3(%arg0: i32) -> (i32, i32) {
    %c0_i32 = arith.constant 0 : i32
    %c0_i32_0 = arith.constant 0 : i32
    %c0_i32_1 = arith.constant 0 : i32
    return %c0_i32, %c0_i32_0 : i32, i32
  }
  func.func @transform_4(%arg0: i32) -> (i32, i32) {
    %c0_i32 = arith.constant 0 : i32
    %c0_i32_0 = arith.constant 0 : i32
    %c0_i32_1 = arith.constant 0 : i32
    return %c0_i32, %c0_i32_0 : i32, i32
  }
  func.func @transform_5(%arg0: i32) -> (i32, i32) {
    %c0_i32 = arith.constant 0 : i32
    %c0_i32_0 = arith.constant 0 : i32
    return %arg0, %c0_i32 : i32, i32
  }
}

</mosaic_0001>

<bundles_post_ra>
// kernel: tpu_custom_call.1
= control target key start
LH: loop header
LB: loop body
LE: loop exit
PB: predicated region body
PF: predicated region fallthrough
CT: control target
= control target key end

     0   :  { %10 = vsyncpa [#allocation3], 0  ;;  %s809_s0 = inlined_call_operand.hbm [shape: f32[8,128], index: 0, kind: input, shape index: {}]   ;;  %s810_s1 = inlined_call_operand.hbm [shape: f32[3,128], index: 1, kind: input, shape index: {}]   ;;  %s811_s2 = inlined_call_operand.hbm [shape: f32[128,128], index: 2, kind: input, shape index: {}]   ;;  %s812_s3 = inlined_call_operand.hbm [shape: f32[128,128], index: 3, kind: input, shape index: {}]   ;;  %s813_s4 = inlined_call_operand.hbm [shape: f32[128,128], index: 4, kind: input, shape index: {}]   ;;  %s814_s5 = inlined_call_operand.hbm [shape: f32[8,128], index: 5, kind: output, shape index: {}]  }
   0x1   :  { %11 = vsyncpa [#allocation6], 0 }
   0x2   :  { %12 = vsyncpa [#allocation9], 0 }
   0x3   :  { %13 = vsyncpa [#allocation4], 0  ;;  %s683_s18 = smov [#allocation5]  }
   0x4   :  { %s30_s19 = sshll.u32 %s683_s18, 4  ;;  %s31_s19 = int_to_ptr.vmem [resolvable:$true] %s30_s19 }
   0x5   :  { %s563_s20 = scalar_lea.vmem %s31_s19, 64  ;;  %p568_p1 = scmp.lt.s32.totalorder %s31_s19, %s31_s19 }
   0x6   :  { %p564_p0 = scmp.ne.s32.totalorder %s31_s19, %s563_s20  ;;  %p569_p2 = scmp.lt.s32.totalorder %s563_s20, %s563_s20 }
   0x8   :  { %p570_p3 = por %p569_p2, %p568_p1 }
   0xa   :  { %p571_p4 = pnand %p570_p3, %p564_p0 }
   0xc   :  { %574 = shalt.err (!%p571_p4)
}
   0xd   :  { %33 = dma.hbm_to_vmem [thread:$0]  %s810_s1, 64, %s31_s19, [#allocation6]  }
   0xe   :  { %s684_s23 = smov [#allocation8]   ;;  %s685_s25 = smov [#allocation2]  }
   0xf   :  { %s51_s24 = sshll.u32 %s684_s23, 4  ;;  %s20_s26 = sshll.u32 %s685_s25, 4  ;;  %s52_s24 = int_to_ptr.vmem [resolvable:$true] %s51_s24  ;;  %s21_s26 = int_to_ptr.vmem [resolvable:$true] %s20_s26 }
  0x10   :  { %s583_s27 = scalar_lea.vmem %s52_s24, 2048  ;;  %p588_p6 = scmp.lt.s32.totalorder %s52_s24, %s52_s24 }
  0x11   :  { %p584_p5 = scmp.ne.s32.totalorder %s52_s24, %s583_s27  ;;  %p589_p7 = scmp.lt.s32.totalorder %s583_s27, %s583_s27 }
  0x13   :  { %p590_p8 = por %p589_p7, %p588_p6 }
  0x15   :  { %p591_p9 = pnand %p590_p8, %p584_p5 }
  0x17   :  { %594 = shalt.err (!%p591_p9)
}
  0x18   :  { %s686_s28 = smov 128   ;;  %s687_s29 = smov 8  }
  0x19   :  { %57 = dma.hbm_to_vmem [thread:$0]  %s812_s3, 2048, %s52_s24, [#allocation9], %s686_s28, %s686_s28, %s687_s29  }
  0x1a   :  { %s603_s1 = scalar_lea.vmem %s21_s26, 128  ;;  %p608_p11 = scmp.lt.s32.totalorder %s21_s26, %s21_s26 }
  0x1b   :  { %p604_p10 = scmp.ne.s32.totalorder %s21_s26, %s603_s1  ;;  %p609_p12 = scmp.lt.s32.totalorder %s603_s1, %s603_s1 }
  0x1d   :  { %p610_p13 = por %p609_p12, %p608_p11 }
  0x1f   :  { %p611_p0 = pnand %p610_p13, %p604_p10 }
  0x21   :  { %614 = shalt.err (!%p611_p0)
}
  0x22   :  { %23 = dma.hbm_to_vmem [thread:$0]  %s809_s0, 128, %s21_s26, [#allocation3]  }
  0x23   :  { %s688_s9 = smov [#allocation7]   ;;  %s689_s11 = smov [#allocation10]  }
  0x24   :  { %s39_s10 = sshll.u32 %s688_s9, 4  ;;  %s63_s12 = sshll.u32 %s689_s11, 4  ;;  %s40_s10 = int_to_ptr.vmem [resolvable:$true] %s39_s10  ;;  %s64_s12 = int_to_ptr.vmem [resolvable:$true] %s63_s12 }
  0x25   :  { %s623_s13 = scalar_lea.vmem %s40_s10, 2048  ;;  %p628_p2 = scmp.lt.s32.totalorder %s40_s10, %s40_s10 }
  0x26   :  { %p624_p1 = scmp.ne.s32.totalorder %s40_s10, %s623_s13  ;;  %p629_p3 = scmp.lt.s32.totalorder %s623_s13, %s623_s13 }
  0x28   :  { %p630_p4 = por %p629_p3, %p628_p2 }
  0x2a   :  { %p631_p5 = pnand %p630_p4, %p624_p1 }
  0x2c   :  { %634 = shalt.err (!%p631_p5)
}
  0x2d   :  { %45 = dma.hbm_to_vmem [thread:$0]  %s811_s2, 2048, %s40_s10, [#allocation6], %s686_s28, %s686_s28, %s687_s29  }
  0x2e   :  { %s643_s0 = scalar_lea.vmem %s64_s12, 2048  ;;  %p648_p7 = scmp.lt.s32.totalorder %s64_s12, %s64_s12 }
  0x2f   :  { %p644_p6 = scmp.ne.s32.totalorder %s64_s12, %s643_s0  ;;  %p649_p8 = scmp.lt.s32.totalorder %s643_s0, %s643_s0 }
  0x31   :  { %p650_p9 = por %p649_p8, %p648_p7 }
  0x33   :  { %p651_p10 = pnand %p650_p9, %p644_p6 }
  0x35   :  { %654 = shalt.err (!%p651_p10)
}
  0x36   :  { %69 = dma.hbm_to_vmem [thread:$0]  %s813_s4, 2048, %s64_s12, [#allocation9], %s686_s28, %s686_s28, %s687_s29  }
  0x37   :  { %675 = dma.done.wait [#allocation3], 128  }
  0x38   :  { %676 = vsyncadd [#allocation3], 4294967168 }
  0x39   :  { %677 = dma.done.wait [#allocation6], 2112  }
  0x3a   :  { %678 = vsyncadd [#allocation6], 4294965184 }
  0x3b   :  { %679 = dma.done.wait [#allocation9], 4096  }
  0x3c   :  { %680 = vsyncadd [#allocation9], 4294963200  ;;  %v690_v0 = vmov 0.0   ;;  %vm691_vm0 = vmmov 0   ;;  %v102_v1 = vld [vmem:[#allocation7 + $0x78] sm:$0xff]  ;;  %v101_v2 = vld [vmem:[#allocation7 + $0x70] sm:$0xff]  ;;  %v103_v38 = vlaneseq }
  0x3d   :  { %436 = vmatprep.subr.mxu0 %v690_v0  ;;  %468 = vmatprep.mubr.msk.f32.mxu0 %vm691_vm0, %v690_v0  ;;  %v100_v3 = vld [vmem:[#allocation7 + $0x68] sm:$0xff]  ;;  %v99_v4 = vld [vmem:[#allocation7 + $0x60] sm:$0xff]  ;;  %v197_v5 = vld [vmem:[#allocation8 + $0x78] sm:$0xff]  ;;  %s692_s2 = smov [#allocation11]  }
  0x3e   :  { %471 = vmatprep.subr.mxu1 %v690_v0  ;;  %503 = vmatprep.mubr.msk.f32.mxu1 %vm691_vm0, %v690_v0  ;;  %v98_v6 = vld [vmem:[#allocation7 + $0x58] sm:$0xff]  ;;  %v196_v7 = vld [vmem:[#allocation8 + $0x70] sm:$0xff]  ;;  %v195_v8 = vld [vmem:[#allocation8 + $0x68] sm:$0xff]  ;;  %v790_v39 = vshrl.u32 %v103_v38, 7  ;;  %s374_s4 = sshll.u32 %s692_s2, 4  ;;  %s375_s4 = int_to_ptr.vmem [resolvable:$true] %s374_s4 }
  0x3f   :  { %437 = vmatpush3.msra.mxu0 %v102_v1  ;;  %472 = vmatpush3.msra.mxu1 %v197_v5  ;;  %v97_v9 = vld [vmem:[#allocation7 + $0x50] sm:$0xff]  ;;  %v194_v10 = vld [vmem:[#allocation8 + $0x60] sm:$0xff]  ;;  %v96_v11 = vld [vmem:[#allocation7 + $0x48] sm:$0xff]  ;;  %s655_s17 = scalar_lea.vmem %s375_s4, 128  ;;  %p660_p12 = scmp.lt.s32.totalorder %s375_s4, %s375_s4 }
  0x40   :  { %438 = vmatprep.subr.mxu0 %v690_v0  ;;  %473 = vmatprep.subr.mxu1 %v690_v0  ;;  %v95_v12 = vld [vmem:[#allocation7 + $0x40] sm:$0xff]  ;;  %v94_v13 = vld [vmem:[#allocation7 + $0x38] sm:$0xff]  ;;  %v93_v14 = vld [vmem:[#allocation7 + $0x30] sm:$0xff]  ;;  %v105_v40 = vsub.s32 0, %v790_v39  ;;  %v200_v63 = vsub.s32 1, %v790_v39  ;;  %p656_p11 = scmp.ne.s32.totalorder %s375_s4, %s655_s17  ;;  %p661_p13 = scmp.lt.s32.totalorder %s655_s17, %s655_s17 }
  0x41   :  { %439 = vmatpush3.msra.mxu0 %v101_v2  ;;  %474 = vmatpush3.msra.mxu1 %v196_v7  ;;  %v92_v15 = vld [vmem:[#allocation7 + $0x28] sm:$0xff]  ;;  %v91_v16 = vld [vmem:[#allocation7 + $0x20] sm:$0xff]  ;;  %v90_v17 = vld [vmem:[#allocation7 + $0x18] sm:$0xff] }
  0x42   :  { %440 = vmatprep.subr.mxu0 %v690_v0  ;;  %475 = vmatprep.subr.mxu1 %v690_v0  ;;  %v89_v18 = vld [vmem:[#allocation7 + $0x10] sm:$0xff]  ;;  %v88_v19 = vld [vmem:[#allocation7 + $0x8] sm:$0xff]  ;;  %v87_v20 = vld [vmem:[#allocation7] sm:$0xff]  ;;  %p662_p0 = por %p661_p13, %p660_p12 }
  0x43   :  { %441 = vmatpush3.msra.mxu0 %v100_v3  ;;  %476 = vmatpush3.msra.mxu1 %v195_v8  ;;  %v86_v21 = vld [vmem:[#allocation2] sm:$0xff]  ;;  %v191_v24 = vld [vmem:[#allocation8 + $0x48] sm:$0xff]  ;;  %v190_v25 = vld [vmem:[#allocation8 + $0x40] sm:$0xff] }
  0x44   :  { %442 = vmatprep.subr.mxu0 %v690_v0  ;;  %477 = vmatprep.subr.mxu1 %v690_v0  ;;  %v193_v22 = vld [vmem:[#allocation8 + $0x58] sm:$0xff]  ;;  %v192_v23 = vld [vmem:[#allocation8 + $0x50] sm:$0xff]  ;;  %v187_v28 = vld [vmem:[#allocation8 + $0x28] sm:$0xff]  ;;  %p663_p1 = pnand %p662_p0, %p656_p11 }
  0x45   :  { %443 = vmatpush3.msra.mxu0 %v99_v4  ;;  %478 = vmatpush3.msra.mxu1 %v194_v10  ;;  %v189_v26 = vld [vmem:[#allocation8 + $0x38] sm:$0xff]  ;;  %v188_v27 = vld [vmem:[#allocation8 + $0x30] sm:$0xff]  ;;  %v186_v29 = vld [vmem:[#allocation8 + $0x20] sm:$0xff]  ;;  %v295_v10 = vsub.s32 2, %v790_v39 }
  0x46   :  { %444 = vmatprep.subr.mxu0 %v690_v0  ;;  %479 = vmatprep.subr.mxu1 %v690_v0  ;;  %v185_v30 = vld [vmem:[#allocation8 + $0x18] sm:$0xff]  ;;  %v184_v31 = vld [vmem:[#allocation8 + $0x10] sm:$0xff]  ;;  %v183_v32 = vld [vmem:[#allocation8 + $0x8] sm:$0xff] }
  0x47   :  { %445 = vmatpush3.msra.mxu0 %v98_v6  ;;  %480 = vmatpush3.msra.mxu1 %v193_v22  ;;  %v182_v33 = vld [vmem:[#allocation8] sm:$0xff]  ;;  %v292_v34 = vld [vmem:[#allocation10 + $0x78] sm:$0xff]  ;;  %v291_v35 = vld [vmem:[#allocation10 + $0x70] sm:$0xff] }
  0x48   :  { %446 = vmatprep.subr.mxu0 %v690_v0  ;;  %481 = vmatprep.subr.mxu1 %v690_v0  ;;  %v290_v36 = vld [vmem:[#allocation10 + $0x68] sm:$0xff]  ;;  %v289_v37 = vld [vmem:[#allocation10 + $0x60] sm:$0xff]  ;;  %v85_v41 = vld [vmem:[#allocation5] sm:$0x7] }
  0x49   :  { %447 = vmatpush3.msra.mxu0 %v97_v9  ;;  %482 = vmatpush3.msra.mxu1 %v192_v23  ;;  %v106_v42 = vrot.slane %v85_v41, %v105_v40  ;;  %v288_v51 = vld [vmem:[#allocation10 + $0x58] sm:$0xff]  ;;  %v287_v52 = vld [vmem:[#allocation10 + $0x50] sm:$0xff]  ;;  %v286_v53 = vld [vmem:[#allocation10 + $0x48] sm:$0xff]  ;;  %v201_v1 = vrot.slane %v85_v41, %v200_v63 }
  0x4a   :  { %448 = vmatprep.subr.mxu0 %v690_v0  ;;  %483 = vmatprep.subr.mxu1 %v690_v0  ;;  %v285_v54 = vld [vmem:[#allocation10 + $0x40] sm:$0xff]  ;;  %v284_v55 = vld [vmem:[#allocation10 + $0x38] sm:$0xff]  ;;  %v283_v56 = vld [vmem:[#allocation10 + $0x30] sm:$0xff] }
  0x4b   :  { %449 = vmatpush3.msra.mxu0 %v96_v11  ;;  %484 = vmatpush3.msra.mxu1 %v191_v24  ;;  %v282_v57 = vld [vmem:[#allocation10 + $0x28] sm:$0xff]  ;;  %v281_v58 = vld [vmem:[#allocation10 + $0x20] sm:$0xff]  ;;  %v280_v59 = vld [vmem:[#allocation10 + $0x18] sm:$0xff]  ;;  %v296_v11 = vrot.slane %v85_v41, %v295_v10 }
  0x4c   :  { %450 = vmatprep.subr.mxu0 %v690_v0  ;;  %485 = vmatprep.subr.mxu1 %v690_v0  ;;  %v279_v60 = vld [vmem:[#allocation10 + $0x10] sm:$0xff]  ;;  %v278_v61 = vld [vmem:[#allocation10 + $0x8] sm:$0xff]  ;;  %v277_v62 = vld [vmem:[#allocation10] sm:$0xff] }
  0x4d   :  { %451 = vmatpush3.msra.mxu0 %v95_v12  ;;  %486 = vmatpush3.msra.mxu1 %v190_v25 }
  0x4e   :  { %452 = vmatprep.subr.mxu0 %v690_v0  ;;  %487 = vmatprep.subr.mxu1 %v690_v0 }
  0x4f   :  { %453 = vmatpush3.msra.mxu0 %v94_v13  ;;  %488 = vmatpush3.msra.mxu1 %v189_v26 }
  0x50   :  { %454 = vmatprep.subr.mxu0 %v690_v0  ;;  %489 = vmatprep.subr.mxu1 %v690_v0 }
  0x51   :  { %455 = vmatpush3.msra.mxu0 %v93_v14  ;;  %490 = vmatpush3.msra.mxu1 %v188_v27 }
  0x52   :  { %456 = vmatprep.subr.mxu0 %v690_v0  ;;  %491 = vmatprep.subr.mxu1 %v690_v0 }
  0x53   :  { %457 = vmatpush3.msra.mxu0 %v92_v15  ;;  %492 = vmatpush3.msra.mxu1 %v187_v28 }
  0x54   :  { %458 = vmatprep.subr.mxu0 %v690_v0  ;;  %493 = vmatprep.subr.mxu1 %v690_v0 }
  0x55   :  { %459 = vmatpush3.msra.mxu0 %v91_v16  ;;  %494 = vmatpush3.msra.mxu1 %v186_v29 }
  0x56   :  { %460 = vmatprep.subr.mxu0 %v690_v0  ;;  %495 = vmatprep.subr.mxu1 %v690_v0 }
  0x57   :  { %461 = vmatpush3.msra.mxu0 %v90_v17  ;;  %496 = vmatpush3.msra.mxu1 %v185_v30 }
  0x58   :  { %462 = vmatprep.subr.mxu0 %v690_v0  ;;  %497 = vmatprep.subr.mxu1 %v690_v0 }
  0x59   :  { %463 = vmatpush3.msra.mxu0 %v89_v18  ;;  %498 = vmatpush3.msra.mxu1 %v184_v31 }
  0x5a   :  { %464 = vmatprep.subr.mxu0 %v690_v0  ;;  %499 = vmatprep.subr.mxu1 %v690_v0 }
  0x5b   :  { %465 = vmatpush3.msra.mxu0 %v88_v19  ;;  %500 = vmatpush3.msra.mxu1 %v183_v32 }
  0x5c   :  { %466 = vmatprep.subr.mxu0 %v690_v0  ;;  %501 = vmatprep.subr.mxu1 %v690_v0 }
  0x5d   :  { %467 = vmatpush3.msra.mxu0 %v87_v20  ;;  %502 = vmatpush3.msra.mxu1 %v182_v33 }
  0x5e   :  { %469 = vmatmul.mubr.f32.vlgmr.msra.gmra.mxu0 %v86_v21  ;;  %506 = vmatprep.subr.mxu0 %v690_v0 }
  0x5f   :  { %538 = vmatprep.mubr.msk.f32.mxu0 %vm691_vm0, %v690_v0  ;;  %507 = vmatpush3.msra.mxu0 %v292_v34 }
  0x60   :  { %508 = vmatprep.subr.mxu0 %v690_v0 }
  0x61   :  { %509 = vmatpush3.msra.mxu0 %v291_v35 }
  0x62   :  { %510 = vmatprep.subr.mxu0 %v690_v0 }
  0x63   :  { %511 = vmatpush3.msra.mxu0 %v290_v36 }
  0x64   :  { %512 = vmatprep.subr.mxu0 %v690_v0 }
  0x65   :  { %513 = vmatpush3.msra.mxu0 %v289_v37 }
  0x66   :  { %514 = vmatprep.subr.mxu0 %v690_v0 }
  0x67   :  { %515 = vmatpush3.msra.mxu0 %v288_v51 }
  0x68   :  { %516 = vmatprep.subr.mxu0 %v690_v0 }
  0x69   :  { %517 = vmatpush3.msra.mxu0 %v287_v52 }
  0x6a   :  { %518 = vmatprep.subr.mxu0 %v690_v0 }
  0x6b   :  { %519 = vmatpush3.msra.mxu0 %v286_v53 }
  0x6c   :  { %520 = vmatprep.subr.mxu0 %v690_v0 }
  0x6d   :  { %521 = vmatpush3.msra.mxu0 %v285_v54 }
  0x6e   :  { %522 = vmatprep.subr.mxu0 %v690_v0 }
  0x6f   :  { %523 = vmatpush3.msra.mxu0 %v284_v55 }
  0x70   :  { %524 = vmatprep.subr.mxu0 %v690_v0 }
  0x71   :  { %525 = vmatpush3.msra.mxu0 %v283_v56 }
  0x72   :  { %526 = vmatprep.subr.mxu0 %v690_v0 }
  0x73   :  { %527 = vmatpush3.msra.mxu0 %v282_v57 }
  0x74   :  { %528 = vmatprep.subr.mxu0 %v690_v0 }
  0x75   :  { %529 = vmatpush3.msra.mxu0 %v281_v58 }
  0x76   :  { %530 = vmatprep.subr.mxu0 %v690_v0 }
  0x77   :  { %531 = vmatpush3.msra.mxu0 %v280_v59 }
  0x78   :  { %532 = vmatprep.subr.mxu0 %v690_v0 }
  0x79   :  { %533 = vmatpush3.msra.mxu0 %v279_v60 }
  0x7a   :  { %534 = vmatprep.subr.mxu0 %v690_v0 }
  0x7b   :  { %535 = vmatpush3.msra.mxu0 %v278_v61 }
  0x7c   :  { %536 = vmatprep.subr.mxu0 %v690_v0 }
  0x7d   :  { %537 = vmatpush3.msra.mxu0 %v277_v62 }
 0x11e   :  { %v173_v43 = vpop.f32.mrf.mxu0 }
 0x11f   :  { %v174_v44 = vadd.f32 %v173_v43, %v106_v42 }
 0x120   :  { %v470_v45 = vpop.f32.mrf.mxu0 }
 0x121   :  { %v178_v46 = vmul.f32 0.70710677, %v174_v44  ;;  %v177_v48 = vmul.f32 0.5, %v174_v44 }
 0x123   :  { %551 = verf.f32 %v178_v46 }
 0x130   :  { %v552_v47 = vpop.eup %551 }
 0x131   :  { %v180_v49 = vadd.f32 1.0, %v552_v47 }
 0x133   :  { %v181_v50 = vmul.f32 %v180_v49, %v177_v48 }
 0x135   :  { %504 = vmatmul.mubr.f32.vlgmr.msra.gmra.mxu1 %v181_v50 }
 0x1f5   :  { %v268_v2 = vpop.f32.mrf.mxu1 }
 0x1f6   :  { %v269_v3 = vadd.f32 %v268_v2, %v201_v1 }
 0x1f7   :  { %v505_v4 = vpop.f32.mrf.mxu1 }
 0x1f8   :  { %v273_v5 = vmul.f32 0.70710677, %v269_v3  ;;  %v272_v7 = vmul.f32 0.5, %v269_v3 }
 0x1fa   :  { %553 = verf.f32 %v273_v5 }
 0x207   :  { %v554_v6 = vpop.eup %553 }
 0x208   :  { %v275_v8 = vadd.f32 1.0, %v554_v6 }
 0x20a   :  { %v276_v9 = vmul.f32 %v275_v8, %v272_v7 }
 0x20c   :  { %539 = vmatmul.mubr.f32.vlgmr.msra.gmra.mxu0 %v276_v9 }
 0x2cc   :  { %v363_v0 = vpop.f32.mrf.mxu0 }
 0x2cd   :  { %v364_v12 = vadd.f32 %v363_v0, %v296_v11 }
 0x2ce   :  { %v540_v13 = vpop.f32.mrf.mxu0 }
 0x2cf   :  { %367 = vst [vmem:[#allocation11] sm:$0xff] %v364_v12 }
 0x2d0   :  { %666 = shalt.err (!%p663_p1)
}
 0x2d1   :  { %377 = dma.vmem_to_hbm [thread:$0]  %s375_s4, 128, %s814_s5, [#allocation4]  }
 0x2d2   :  { %681 = dma.done.wait [#allocation4], 128  }
 0x2d3   :  { %682 = vsyncadd [#allocation4], 4294967168 }
 0x2d4   :  { %381 = vsyncpa [#allocation3], 1 }
 0x2d5   :  { %382 = vsyncpa [#allocation6], 1 }
 0x2d6   :  { %383 = vsyncpa [#allocation9], 1 }
 0x2d7   :  { %384 = vsyncpa [#allocation4], 1 }

</bundles_post_ra>
